<compile_context>
chip_gen: v6e
topology: v6e:2x2x1
jax: 0.10.0
libtpu: 0.0.40
codegen_flags: <defaults>
</compile_context>

<pallas_src>
import functools

import jax
import jax.numpy as jnp
from jax.experimental import pallas as pl
from jax.experimental.pallas import tpu as pltpu


def _round_up(n, m):
    return ((n + m - 1) // m) * m


def _syn_relu_kernel(x_ref, w1_ref, w2_ref, w3_ref, o_ref):
    # Fused hot path: matmul -> relu -> matmul -> relu -> matmul.
    # MXU inputs are in the weights' compute dtype (bf16 or f32); all
    # accumulation and the ReLUs stay in f32.
    x = x_ref[...].astype(w1_ref.dtype)          # no-op if x already bf16
    h1 = jnp.dot(x, w1_ref[...], preferred_element_type=jnp.float32)
    h1 = jnp.maximum(h1, 0.0).astype(w2_ref.dtype)
    h2 = jnp.dot(h1, w2_ref[...], preferred_element_type=jnp.float32)
    h2 = jnp.maximum(h2, 0.0).astype(w3_ref.dtype)
    h3 = jnp.dot(h2, w3_ref[...], preferred_element_type=jnp.float32)
    o_ref[...] = h3.astype(o_ref.dtype)


def prepare_weights(w1, w2, w3, compute_dtype=jnp.bfloat16):
    """One-time (outside the hot path) weight prep.

    Takes PyTorch-layout Linear weights (out_features, in_features) and
    returns transposed, compute-dtype weights with the two hidden widths
    zero-padded to multiples of 128 (lane-dense intermediates).  The final
    output width (third_layer) is NOT padded — the output array is written at
    its true width.  Zero-padded hidden columns contribute nothing
    (ReLU(0)=0 and the matching w2t/w3t rows are zero), so semantics match
    the PyTorch module.
    """
    first_layer, input_size = w1.shape
    second_layer, _ = w2.shape
    third_layer, _ = w3.shape
    f1p = _round_up(first_layer, 128)
    f2p = _round_up(second_layer, 128)

    w1t = (jnp.zeros((input_size, f1p), compute_dtype)
           .at[:, :first_layer].set(w1.T.astype(compute_dtype)))
    w2t = (jnp.zeros((f1p, f2p), compute_dtype)
           .at[:first_layer, :second_layer].set(w2.T.astype(compute_dtype)))
    w3t = (jnp.zeros((f2p, third_layer), compute_dtype)
           .at[:second_layer, :].set(w3.T.astype(compute_dtype)))
    return (w1t, w2t, w3t)


def _pick_batch_tile(B, tile_m):
    """Batch tile: as large as requested, but always >=2 grid steps when
    B > 8 so v7x's two TensorCores both get work; multiple of 8 (sublane)."""
    tm = min(tile_m, B)
    if B > 8:
        tm = min(tm, _round_up(pl.cdiv(B, 2), 8))
    return max(tm, 1)


@functools.partial(jax.jit, static_argnames=("tile_m",))
def syn_relu_forward(x, w1t, w2t, w3t, *, tile_m=2048):
    """x: (B, input_size). w1t/w2t/w3t: outputs of prepare_weights."""
    B, input_size = x.shape
    n_out = w3t.shape[1]            # true third_layer (unpadded)

    tm = _pick_batch_tile(B, tile_m)
    grid = (pl.cdiv(B, tm),)

    return pl.pallas_call(
        _syn_relu_kernel,
        out_shape=jax.ShapeDtypeStruct((B, n_out), x.dtype),
        grid=grid,
        in_specs=[
            # x tile walks the batch; weights stay VMEM-resident (same block
            # index every step -> no re-DMA).
            pl.BlockSpec((tm, input_size), lambda i: (i, 0)),
            pl.BlockSpec(w1t.shape, lambda i: (0, 0)),
            pl.BlockSpec(w2t.shape, lambda i: (0, 0)),
            pl.BlockSpec(w3t.shape, lambda i: (0, 0)),
        ],
        # Last dim == full array dim, so (tm, third_layer) is a legal block
        # even though third_layer < 128; the (tm, 16) slab is contiguous in
        # HBM so the writeback DMA stays dense.
        out_specs=pl.BlockSpec((tm, n_out), lambda i: (i, 0)),
        compiler_params=pltpu.CompilerParams(
            dimension_semantics=("parallel",),     # 2 TCs on v7x
            vmem_limit_bytes=32 * 1024 * 1024,     # safe on v5e/v6e/v7x
        ),
    )(x, w1t, w2t, w3t)


def syn_relu(x, prepped, *, tile_m=2048):
    w1t, w2t, w3t = prepped
    return syn_relu_forward(x, w1t, w2t, w3t, tile_m=tile_m)


def _reference_f32(x, w1, w2, w3):
    h = jnp.maximum(x @ w1.T, 0.0)
    h = jnp.maximum(h @ w2.T, 0.0)
    return h @ w3.T


def _reference_bf16(x, w1, w2, w3):
    # Same mixed-precision recipe as the kernel: bf16 MXU inputs, f32 acc.
    def mm(a, b):
        return jnp.dot(a.astype(jnp.bfloat16), b.astype(jnp.bfloat16),
                       preferred_element_type=jnp.float32)
    h = jnp.maximum(mm(x, w1.T), 0.0)
    h = jnp.maximum(mm(h, w2.T), 0.0)
    return mm(h, w3.T)


if __name__ == "__main__":
    # Module-consistent small shapes: input_size=32, first_layer=64,
    # second_layer=48, third_layer=16, batch=32.
    batch, input_size = 32, 32
    first_layer, second_layer, third_layer = 64, 48, 16

    key = jax.random.PRNGKey(0)
    kx, k1, k2, k3 = jax.random.split(key, 4)

    x = jax.random.normal(kx, (batch, input_size), dtype=jnp.float32)
    # PyTorch Linear weight convention: (out_features, in_features).
    w1 = jax.random.normal(k1, (first_layer, input_size), dtype=jnp.float32) * 0.1
    w2 = jax.random.normal(k2, (second_layer, first_layer), dtype=jnp.float32) * 0.1
    w3 = jax.random.normal(k3, (third_layer, second_layer), dtype=jnp.float32) * 0.1

    # --- bf16 MXU-input path (default; recommended on all generations,
    #     required for good perf on v5e). Default tile_m -> grid of 2 steps. ---
    prepped_bf16 = prepare_weights(w1, w2, w3)  # bf16 default
    out_bf16 = jax.block_until_ready(syn_relu(x, prepped_bf16))
    ref_bf16 = _reference_bf16(x, w1, w2, w3)
    assert out_bf16.shape == (batch, third_layer)
    assert jnp.allclose(out_bf16, ref_bf16, atol=1e-2, rtol=1e-2)

    # --- f32 compute path (debug-only; MXU decomposes f32, so it is close
    #     but not bit-exact vs. an XLA f32 reference). tile_m=8 forces a
    #     4-step grid to exercise pipelining + partial-width output stores. ---
    prepped_f32 = prepare_weights(w1, w2, w3, compute_dtype=jnp.float32)
    out_f32 = jax.block_until_ready(syn_relu(x, prepped_f32, tile_m=8))
    ref_f32 = _reference_f32(x, w1, w2, w3)
    assert out_f32.shape == (batch, third_layer)
    assert jnp.allclose(out_f32, ref_f32, atol=1e-4, rtol=1e-4)

    print("KERNEL_OK")
</pallas_src>

<mosaic_0001>
module attributes {stable_mosaic.version = 11 : i64} {
  func.func @_syn_relu_kernel(%arg0: i32, %arg1: memref<16x32xf32, #tpu.memory_space<vmem>>, %arg2: memref<32x128xbf16, #tpu.memory_space<vmem>>, %arg3: memref<128x128xbf16, #tpu.memory_space<vmem>>, %arg4: memref<128x16xbf16, #tpu.memory_space<vmem>>, %arg5: memref<16x16xf32, #tpu.memory_space<vmem>>) attributes {dimension_semantics = [#tpu.dimension_semantics<parallel>], iteration_bounds = array<i64: 2>, scalar_prefetch = 0 : i64, scratch_operands = 0 : i64, tpu.core_type = #tpu.core_type<tc>, window_params = [{transform_indices = @transform_0, window_bounds = array<i64: 16, 32>}, {pipeline_mode = #tpu.pipeline_mode<synchronous>, transform_indices = @transform_1, window_bounds = array<i64: 32, 128>}, {pipeline_mode = #tpu.pipeline_mode<synchronous>, transform_indices = @transform_2, window_bounds = array<i64: 128, 128>}, {pipeline_mode = #tpu.pipeline_mode<synchronous>, transform_indices = @transform_3, window_bounds = array<i64: 128, 16>}, {transform_indices = @transform_4, window_bounds = array<i64: 16, 16>}]} {
    %c0 = arith.constant 0 : index
    %c0_0 = arith.constant 0 : index
    %0 = vector.load %arg1[%c0, %c0_0] : memref<16x32xf32, #tpu.memory_space<vmem>>, vector<16x32xf32>
    %1 = arith.truncf %0 : vector<16x32xf32> to vector<16x32xbf16>
    %c0_1 = arith.constant 0 : index
    %c0_2 = arith.constant 0 : index
    %2 = vector.load %arg2[%c0_1, %c0_2] : memref<32x128xbf16, #tpu.memory_space<vmem>>, vector<32x128xbf16>
    %cst = arith.constant dense<0.000000e+00> : vector<16x128xf32>
    %3 = tpu.matmul %1, %2, %cst {dimension_numbers = #tpu.dot_dimension_numbers<[1], [0], [0], [1], [0, 0, 1, 1], [], []>} : vector<16x32xbf16>, vector<32x128xbf16>, vector<16x128xf32> -> vector<16x128xf32>
    %cst_3 = arith.constant 0.000000e+00 : f32
    %4 = vector.broadcast %cst_3 : f32 to vector<16x128xf32>
    %5 = arith.maximumf %3, %4 : vector<16x128xf32>
    %6 = arith.truncf %5 : vector<16x128xf32> to vector<16x128xbf16>
    %c0_4 = arith.constant 0 : index
    %c0_5 = arith.constant 0 : index
    %7 = vector.load %arg3[%c0_4, %c0_5] : memref<128x128xbf16, #tpu.memory_space<vmem>>, vector<128x128xbf16>
    %cst_6 = arith.constant dense<0.000000e+00> : vector<16x128xf32>
    %8 = tpu.matmul %6, %7, %cst_6 {dimension_numbers = #tpu.dot_dimension_numbers<[1], [0], [0], [1], [0, 0, 1, 1], [], []>} : vector<16x128xbf16>, vector<128x128xbf16>, vector<16x128xf32> -> vector<16x128xf32>
    %cst_7 = arith.constant 0.000000e+00 : f32
    %9 = vector.broadcast %cst_7 : f32 to vector<16x128xf32>
    %10 = arith.maximumf %8, %9 : vector<16x128xf32>
    %11 = arith.truncf %10 : vector<16x128xf32> to vector<16x128xbf16>
    %c0_8 = arith.constant 0 : index
    %c0_9 = arith.constant 0 : index
    %12 = vector.load %arg4[%c0_8, %c0_9] : memref<128x16xbf16, #tpu.memory_space<vmem>>, vector<128x16xbf16>
    %cst_10 = arith.constant dense<0.000000e+00> : vector<16x16xf32>
    %13 = tpu.matmul %11, %12, %cst_10 {dimension_numbers = #tpu.dot_dimension_numbers<[1], [0], [0], [1], [0, 0, 1, 1], [], []>} : vector<16x128xbf16>, vector<128x16xbf16>, vector<16x16xf32> -> vector<16x16xf32>
    %c0_11 = arith.constant 0 : index
    %c0_12 = arith.constant 0 : index
    %14 = vector.load %arg5[%c0_11, %c0_12] : memref<16x16xf32, #tpu.memory_space<vmem>>, vector<16x16xf32>
    tpu.vector_store %arg5[%c0_11, %c0_12], %13 {strides = array<i32>} : memref<16x16xf32, #tpu.memory_space<vmem>>, vector<16x16xf32>,
    return
  }
  func.func @transform_0(%arg0: i32) -> (i32, i32) {
    %c0_i32 = arith.constant 0 : i32
    %c0_i32_0 = arith.constant 0 : i32
    return %arg0, %c0_i32 : i32, i32
  }
  func.func @transform_1(%arg0: i32) -> (i32, i32) {
    %c0_i32 = arith.constant 0 : i32
    %c0_i32_0 = arith.constant 0 : i32
    %c0_i32_1 = arith.constant 0 : i32
    return %c0_i32, %c0_i32_0 : i32, i32
  }
  func.func @transform_2(%arg0: i32) -> (i32, i32) {
    %c0_i32 = arith.constant 0 : i32
    %c0_i32_0 = arith.constant 0 : i32
    %c0_i32_1 = arith.constant 0 : i32
    return %c0_i32, %c0_i32_0 : i32, i32
  }
  func.func @transform_3(%arg0: i32) -> (i32, i32) {
    %c0_i32 = arith.constant 0 : i32
    %c0_i32_0 = arith.constant 0 : i32
    %c0_i32_1 = arith.constant 0 : i32
    return %c0_i32, %c0_i32_0 : i32, i32
  }
  func.func @transform_4(%arg0: i32) -> (i32, i32) {
    %c0_i32 = arith.constant 0 : i32
    %c0_i32_0 = arith.constant 0 : i32
    return %arg0, %c0_i32 : i32, i32
  }
}

</mosaic_0001>

<bundles_post_ra>
// kernel: syn_relu_forward.1
= control target key start
LH: loop header
LB: loop body
LE: loop exit
PB: predicated region body
PF: predicated region fallthrough
CT: control target
= control target key end

     0   :  { %9 = vsyncpa [#allocation3], 0  ;;  %s1102_s0 = inlined_call_operand.hbm [shape: f32[32,32], index: 0, kind: input, shape index: {}]   ;;  %s1103_s1 = inlined_call_operand.hbm [shape: bf16[32,128], index: 1, kind: input, shape index: {}]   ;;  %s1104_s2 = inlined_call_operand.vmem [shape: bf16[128,128], index: 2, kind: input, shape index: {}]   ;;  %s1105_s3 = inlined_call_operand.vmem [shape: bf16[128,16], index: 3, kind: input, shape index: {}]   ;;  %s1106_s4 = inlined_call_operand.vmem [shape: f32[32,16], index: 4, kind: output, shape index: {}]  }
   0x1   :  { %11 = vsyncpa [#allocation3 + $0x1], 0 }
   0x2   :  { %12 = vsyncpa [#allocation5], 0  ;;  %s901_s15 = smov 0   ;;  %s903_s16 = smov 0  }
   0x3   :  { %s905_s17 = smov 0   ;;  %s907_s18 = smov 0  }
   0x4 LB: > { %s596_s19 = sadd.s32 4294967295, %s866_s18   ;;  %p38_p0 = scmp.ne.s32.totalorder %s858_s16, %s854_s15  ;;  %s866_s18 = sphi %s907_s18, %s1122_s18   ;;  %s862_s17 = sphi %s905_s17, %s1121_s17   ;;  %s858_s16 = sphi %s903_s16, %s1120_s16   ;;  %s854_s15 = sphi %s901_s15, %s1119_s15  }
   0x5   : > { %p923_p1 = scmp.eq.s32.totalorder %s596_s19, 0  ;;  %p598_p2 = scmp.ge.s32.totalorder %s866_s18, 1 }
   0x6   : > { %p138_p3 = scmp.lt.s32.totalorder %s866_s18, 3  ;;  %s868_s23 = smov [#allocation4]  }
   0x7   : > { %s1111_s20 = scalar_select %p923_p1, 1, 0 }
   0x8   : > { %p931_p4 = por %p923_p1, %p38_p0  ;;  %p935_p5 = pnand %p598_p2, %p138_p3 }
   0x9   : > { %s150_s24 = sshll.u32 %s868_s23, 4  ;;  %s948_s26 = sadd.s32 1, %s866_s18   ;;  %s151_s24 = int_to_ptr.vmem [resolvable:$true] %s150_s24 }
   0xa   : > { %s1112_s21 = scalar_select %p931_p4, 1, 0 }
   0xb   : > { %s1113_s22 = scalar_select %p935_p5, 1, 0 }
   0xc   : > { %p706_p6 = pneg %p935_p5  ;;  %s25_s27 = sadd.s32 1, %s862_s17 }
   0xd   : > { %s22_s28 = ssub.s32 %s866_s18, %s948_s26  ;;  %s785_s29 = scalar_lea.vmem %s151_s24, 256 }
   0xe   : > { %p943_p7 = pnand %p706_p6, %p923_p1  ;;  %p786_p9 = scmp.ne.s32.totalorder %s151_s24, %s785_s29 }
   0xf   : > { %p793_p12 = scmp.lt.s32.totalorder %s151_s24, %s151_s24  ;;  %p794_p13 = scmp.lt.s32.totalorder %s785_s29, %s785_s29 }
  0x10   : > { %p776_p8 = pneg %p943_p7 }
  0x11   : > { %p795_p0 = por %p794_p13, %p793_p12 }
  0x12   : > { %p788_p10 = pnand %p786_p9, %p776_p8 }
  0x14   : > { %p789_p11 = pneg %p788_p10 }
  0x16   : > { %p796_p2 = pnand %p795_p0, %p789_p11 }
  0x18   : > { %799 = shalt.err (!%p796_p2)
}
  0x19   : > { %s869_s30 = smov 64   ;;  %s870_s5 = smov 4  }
  0x1a   : > { %709 = dma.hbm_to_vmem [thread:$0]  (!%p943_p7), %s1103_s1, 256, %s151_s24, [#allocation5], %s869_s30, %s869_s30, %s870_s5  }
  0x1b   : > { %p23_p3 = scmp.eq.s32.totalorder %s22_s28, 0  ;;  %p32_p6 = scmp.ne.s32.totalorder %s862_s17, %s858_s16 }
  0x1c   : > { %p33_p8 = scmp.eq.s32.totalorder %s866_s18, 0  ;;  %p715_p9 = scmp.lt.s32.totalorder %s866_s18, 2 }
  0x1d   : > { %s965_s8 = scalar_select %p23_p3, %s862_s17, %s25_s27  }
  0x1e   : > { %p34_p10 = por %p33_p8, %p32_p6  ;;  %s170_s9 = sand.u32 1, %s862_s17  }
  0x1f   : > { %s601_s10 = sshll.u32 %s170_s9, 4  ;;  %s630_s11 = sshll.u32 %s866_s18, 8 }
  0x20   : > { %s972_s14 = scalar_lea.hbm %s1102_s0, %s630_s11  ;;  %s174_s15 = scalar_lea.vmem [#allocation2], %s601_s10 }
  0x21   : > { %s181_s23 = sshll.u32 %s174_s15, 4  ;;  %p976_p7 = pnand %p715_p9, %p34_p10  ;;  %s974_s23 = int_to_ptr.vmem [resolvable:$true] %s181_s23 }
  0x22   : > { %s980_s25 = scalar_lea.sflag [#allocation3], %s170_s9  ;;  %s800_s27 = scalar_lea.hbm %s972_s14, 256 }
  0x23   : > { %p801_p11 = scmp.ne.s32.totalorder %s972_s14, %s800_s27  ;;  %p802_p12 = pneg %p976_p7 }
  0x24   : > { %s805_s30 = scalar_lea.hbm %s1102_s0, 512  ;;  %p806_p2 = scmp.lt.s32.totalorder %s972_s14, %s1102_s0 }
  0x25   : > { %p803_p13 = pnand %p802_p12, %p801_p11  ;;  %p807_p3 = scmp.lt.s32.totalorder %s805_s30, %s800_s27 }
  0x27   : > { %p804_p0 = pneg %p803_p13  ;;  %p808_p6 = por %p807_p3, %p806_p2 }
  0x29   : > { %p809_p8 = pnand %p808_p6, %p804_p0 }
  0x2b   : > { %812 = shalt.err (!%p809_p8)
}
  0x2c   : > { %s813_s7 = scalar_lea.vmem %s974_s23, 256  ;;  %s871_s9 = smov [#allocation2]  }
  0x2d   : > { %p814_p9 = scmp.ne.s32.totalorder %s974_s23, %s813_s7  ;;  %s818_s10 = sshll.u32 %s871_s9, 4  ;;  %s819_s10 = int_to_ptr.vmem [resolvable:$false] %s818_s10 }
  0x2e   : > { %s820_s11 = scalar_lea.vmem %s819_s10, 512  ;;  %p821_p13 = scmp.lt.s32.totalorder %s974_s23, %s819_s10 }
  0x2f   : > { %p816_p10 = pnand %p814_p9, %p802_p12  ;;  %p822_p1 = scmp.lt.s32.totalorder %s820_s11, %s813_s7 }
  0x31   : > { %p817_p11 = pneg %p816_p10  ;;  %p823_p4 = por %p822_p1, %p821_p13 }
  0x33   : > { %p824_p5 = pnand %p823_p4, %p817_p11 }
  0x35   : > { %827 = shalt.err (!%p824_p5)
}
  0x36   : > { %s872_s12 = smov 128   ;;  %s873_s13 = smov 8  }
  0x37   : > { %713 = dma.hbm_to_vmem [thread:$0]  (!%p976_p7), %s972_s14, 256, %s974_s23, %s980_s25, %s872_s12, %s872_s12, %s873_s13  }
  0x38   : > { %p1116_p12 = scmp.ne.s32.totalorder %s1113_s22, 0 }
  0x39   : > { %s195_s15 = sand.u32 (!%p1116_p12), 1, %s858_s16   ;;  %p1117_p1 = scmp.ne.s32.totalorder (!%p1116_p12), %s1112_s21, 0 }
  0x3a   : > { %193 = sbr.rel (%p1116_p12) target bundleno = 678 (0x2a6), region = 36  ;;  %s605_s27 = sshll.u32 (!%p1116_p12), %s195_s15, 4 }
  0x3b   : > { %s196_s28 = scalar_lea.sflag (!%p1116_p12), [#allocation3], %s195_s15  ;;  %s199_s29 = scalar_lea.vmem (!%p1116_p12), [#allocation2], %s605_s27 }
  0x3f   : > { %845 = dma.done.wait (%p1117_p1), %s196_s28, 256  }
  0x40   : > { %847 = vsyncadd (%p1117_p1), %s196_s28, 4294967040  ;;  %p1118_p4 = scmp.ne.s32.totalorder %s1111_s20, 0 }
  0x42   : > { %849 = dma.done.wait (%p1118_p4), [#allocation5], 256  }
  0x43   : > { %851 = vsyncadd (%p1118_p4), [#allocation5], 4294967040  ;;  %v874_v0 = vmov 0.0   ;;  %vm875_vm0 = vmmov 0   ;;  %v756_v1 = vld [vmem:[#allocation4 + $0x8] sm:$0xff]   ;;  %v757_v2 = vld [vmem:[#allocation4] sm:$0xff]  }
  0x44   : > { %652 = vmatprep.subr.bf16.mxu0 %v874_v0  ;;  %656 = vmatprep.mubr.msk.bf16.mxu0 %vm875_vm0, %v874_v0  ;;  %v236_v3 = vld [vmem:[%s199_s29] sm:$0xff]  ;;  %v237_v4 = vld [vmem:[%s199_s29 + $0x8] sm:$0xff]  ;;  %vm255_vm1 = vcmask 261120   ;;  %s607_s10 = sshll.u32 %s596_s19, 1  ;;  %vm516_vm2 = vcmask 130048  }
  0x45   : > { %660 = vmatprep.subr.bf16.mxu1 %v874_v0  ;;  %676 = vmatprep.mubr.msk.bf16.mxu1 %vm875_vm0, %v874_v0  ;;  %v758_v5 = vld [vmem:[%s1104_s2 + $0x38] sm:$0xff]   ;;  %v238_v6 = vpack.c.bf16 %v237_v4, %v236_v3  ;;  %v759_v7 = vld [vmem:[%s1104_s2 + $0x30] sm:$0xff]   ;;  %v760_v8 = vld [vmem:[%s1104_s2 + $0x28] sm:$0xff]   ;;  %p230_p5 = scmp.lt.s32.totalorder %s607_s10, 3 }
  0x46   : > { %653 = vmatpush3.bf16.msra.mxu0 %v756_v1  ;;  %661 = vmatpush3.bf16.msra.mxu1 %v758_v5  ;;  %v761_v9 = vld [vmem:[%s1104_s2 + $0x20] sm:$0xff]   ;;  %v762_v10 = vld [vmem:[%s1104_s2 + $0x18] sm:$0xff]   ;;  %v763_v11 = vld [vmem:[%s1104_s2 + $0x10] sm:$0xff]  }
  0x47   : > { %654 = vmatprep.subr.bf16.mxu0 %v874_v0  ;;  %662 = vmatprep.subr.bf16.mxu1 %v874_v0  ;;  %v764_v12 = vld [vmem:[%s1104_s2 + $0x8] sm:$0xff]   ;;  %v765_v13 = vld [vmem:[%s1104_s2] sm:$0xff]   ;;  %v766_v14 = vld [vmem:[%s1105_s3 + $0x38] sm:$0xff]   ;;  %s1124_s10 = smov (!%p230_p5, %s607_s10), 3 }
  0x48   : > { %v767_v15 = vld [vmem:[%s1105_s3 + $0x30] sm:$0xff]   ;;  %v768_v16 = vld [vmem:[%s1105_s3 + $0x28] sm:$0xff]   ;;  %v769_v17 = vld [vmem:[%s1105_s3 + $0x20] sm:$0xff]   ;;  %s608_s11 = sshll.u32 %s1124_s10, 3 }
  0x49   : > { %v770_v18 = vld [vmem:[%s1105_s3 + $0x18] sm:$0xff]   ;;  %v771_v19 = vld [vmem:[%s1105_s3 + $0x10] sm:$0xff]   ;;  %v772_v27 = vld [vmem:[%s1105_s3 + $0x8] sm:$0xff]   ;;  %s233_s15 = scalar_lea.vmem %s1106_s4, %s608_s11 }
  0x4a   : > { %655 = vmatpush3.bf16.msra.mxu0 %v757_v2  ;;  %663 = vmatpush3.bf16.msra.mxu1 %v759_v7  ;;  %v773_v28 = vld [vmem:[%s1105_s3] sm:$0xff]  }
  0x4b   : > { %680 = vmatprep.subr.bf16.mxu0 %v874_v0  ;;  %664 = vmatprep.subr.bf16.mxu1 %v874_v0 }
  0x4d   : > { %657 = vmatmul.mubr.msk.bf16.vlgmr.msra.gmra.mxu0 %vm255_vm1, %v238_v6 }
  0x4e   : > { %696 = vmatprep.mubr.msk.bf16.mxu0 %vm875_vm0, %v874_v0  ;;  %665 = vmatpush3.bf16.msra.mxu1 %v760_v8 }
  0x4f   : > { %666 = vmatprep.subr.bf16.mxu1 %v874_v0  ;;  %681 = vmatpush3.bf16.msra.mxu0 %v766_v14 }
  0x50   : > { %682 = vmatprep.subr.bf16.mxu0 %v874_v0 }
  0x52   : > { %667 = vmatpush3.bf16.msra.mxu1 %v761_v9 }
  0x53   : > { %668 = vmatprep.subr.bf16.mxu1 %v874_v0  ;;  %683 = vmatpush3.bf16.msra.mxu0 %v767_v15 }
  0x54   : > { %684 = vmatprep.subr.bf16.mxu0 %v874_v0 }
  0x56   : > { %669 = vmatpush3.bf16.msra.mxu1 %v762_v10 }
  0x57   : > { %670 = vmatprep.subr.bf16.mxu1 %v874_v0  ;;  %685 = vmatpush3.bf16.msra.mxu0 %v768_v16 }
  0x58   : > { %686 = vmatprep.subr.bf16.mxu0 %v874_v0 }
  0x5a   : > { %671 = vmatpush3.bf16.msra.mxu1 %v763_v11 }
  0x5b   : > { %672 = vmatprep.subr.bf16.mxu1 %v874_v0  ;;  %687 = vmatpush3.bf16.msra.mxu0 %v769_v17 }
  0x5c   : > { %688 = vmatprep.subr.bf16.mxu0 %v874_v0 }
  0x5e   : > { %673 = vmatpush3.bf16.msra.mxu1 %v764_v12 }
  0x5f   : > { %674 = vmatprep.subr.bf16.mxu1 %v874_v0  ;;  %689 = vmatpush3.bf16.msra.mxu0 %v770_v18 }
  0x60   : > { %690 = vmatprep.subr.bf16.mxu0 %v874_v0 }
  0x62   : > { %675 = vmatpush3.bf16.msra.mxu1 %v765_v13 }
  0x63   : > { %691 = vmatpush3.bf16.msra.mxu0 %v771_v19 }
  0x64   : > { %692 = vmatprep.subr.bf16.mxu0 %v874_v0 }
  0x67   : > { %693 = vmatpush3.bf16.msra.mxu0 %v772_v27 }
  0x68   : > { %694 = vmatprep.subr.bf16.mxu0 %v874_v0 }
  0x6b   : > { %695 = vmatpush3.bf16.msra.mxu0 %v773_v28 }
 0x10d   : > { %v293_v20 = vpop.f32.mrf.mxu0 }
 0x10e   : > { %v300_v23 = vmax.f32 %v293_v20, 0.0 }
 0x10f   : > { %v658_v21 = vpop.f32.mrf.mxu0 }
 0x111   : > { %v296_v22 = vpop.f32.mrf.mxu0 }
 0x112   : > { %v301_v24 = vmax.f32 %v296_v22, 0.0 }
 0x113   : > { %v659_v25 = vpop.f32.mrf.mxu0 }
 0x114   : > { %v302_v26 = vpack.c.bf16 %v301_v24, %v300_v23 }
 0x116   : > { %677 = vmatmul.mubr.bf16.vlgmr.msra.gmra.mxu1 %v302_v26 }
 0x1d6   : > { %v401_v29 = vpop.f32.mrf.mxu1 }
 0x1d7   : > { %v408_v32 = vmax.f32 %v401_v29, 0.0 }
 0x1d8   : > { %v678_v30 = vpop.f32.mrf.mxu1 }
 0x1da   : > { %v404_v31 = vpop.f32.mrf.mxu1 }
 0x1db   : > { %v409_v33 = vmax.f32 %v404_v31, 0.0 }
 0x1dc   : > { %v679_v34 = vpop.f32.mrf.mxu1 }
 0x1dd   : > { %v410_v35 = vpack.c.bf16 %v409_v33, %v408_v32 }
 0x1df   : > { %697 = vmatmul.mubr.bf16.vlgmr.msra.gmra.mxu0 %v410_v35 }
 0x29f   : > { %v509_v36 = vpop.f32.mrf.mxu0 }
 0x2a0   : > { %517 = vst.msk [vmem:[%s233_s15] sm:$0xff] %vm516_vm2, %v509_v36 }
 0x2a1   : > { %v698_v37 = vpop.f32.mrf.mxu0 }
 0x2a3   : > { %v512_v38 = vpop.f32.mrf.mxu0 }
 0x2a4   : > { %518 = vst.msk [vmem:[%s233_s15 + $0x8] sm:$0xff] %vm516_vm2, %v512_v38 }
 0x2a5   : > { %v699_v39 = vpop.f32.mrf.mxu0 }
 0x2a6 PF: > { %p15_p7 = scmp.ge.s32.totalorder %s948_s26, 4   ;;  %s1119_s15 = smov %s858_s16 }
 0x2a7   : > { %s1120_s16 = smov %s862_s17  ;;  %s1121_s17 = smov %s965_s8 }
 0x2a8   : > { %s1122_s18 = smov %s948_s26  ;;  %17 = sbr.rel (!%p15_p7) target bundleno = 4 (0x4), region = 80 }
 0x2ad   :  { %541 = vsyncpa [#allocation3], 1 }
 0x2ae   :  { %543 = vsyncpa [#allocation3 + $0x1], 1 }
 0x2af   :  { %544 = vsyncpa [#allocation5], 1 }

</bundles_post_ra>
